<compile_context>
chip_gen: v7x
topology: tpu7x:2x2x1
jax: 0.10.0
libtpu: 0.0.40
codegen_flags: <defaults>
</compile_context>

<pallas_src>
import jax
import jax.numpy as jnp
import numpy as np
from jax.experimental import pallas as pl
from jax.experimental.pallas import tpu as pltpu

NORM_EPS = 1e-12   # guards padded/zero rows; below f32 resolution for real rows
PACK = 4           # tokens packed per output row (PACK * n_embd = 128 lanes for E=32)


def _round_up(x, m):
    return ((x + m - 1) // m) * m


def normalized_embedding_kernel(ids_ref, tbl_ref, o_ref):
    """One grid step: gather + L2-normalize PACK*Rt token embeddings.

    ids_ref : (Rt, PACK)     int32  token ids, PACK tokens per output row
    tbl_ref : (V, E)         bf16   embedding table (VMEM resident, single-buffered)
    o_ref   : (Rt, PACK*E)   f32    lane-dense normalized embeddings
    """
    ids = ids_ref[...]
    rt = ids.shape[0]
    v, _ = tbl_ref.shape

    # Clamp like a real gather (an out-of-range id would otherwise give an all-zero
    # one-hot row and a silent zero embedding).
    ids = jnp.clip(ids, 0, v - 1)

    # Stack the PACK id columns along sublanes -> one (PACK*Rt, 1) column, then one
    # one-hot compare and a single bf16 MXU matmul for the whole tile.
    id_col = jnp.concatenate([ids[:, g:g + 1] for g in range(PACK)], axis=0)
    col_iota = jax.lax.broadcasted_iota(jnp.int32, (PACK * rt, v), 1)
    one_hot = (id_col == col_iota).astype(jnp.bfloat16)              # (PACK*Rt, V)

    emb = jnp.dot(one_hot, tbl_ref[...],
                  preferred_element_type=jnp.float32)                # (PACK*Rt, E) f32

    # NormalizedEmbedding: x / ||x||_2 along the feature dim, written as x * rsqrt
    # (one EUP op in a free slot instead of sqrt + divide).
    inv_norm = jax.lax.rsqrt(jnp.sum(emb * emb, axis=-1, keepdims=True) + NORM_EPS)
    emb = emb * inv_norm

    # Re-pack the PACK sublane groups along lanes: output row r holds tokens
    # PACK*r .. PACK*r+PACK-1, so stores are full-lane vst and the wrapper reshape
    # back to (M, E) is row-major and free.
    o_ref[...] = jnp.concatenate(
        [emb[g * rt:(g + 1) * rt, :] for g in range(PACK)], axis=-1)


def _vmem_limit_bytes():
    # Leave headroom below physical VMEM (v7x: 64 MiB/TC -> ~48 MiB;
    # v5e/v6e: 128 MiB -> ~96 MiB).
    try:
        cap = pltpu.get_tpu_info().vmem_capacity_bytes
    except Exception:
        cap = 64 * 1024 * 1024
    return int(min(cap * 3 // 4, 100 * 1024 * 1024))


def _pick_row_tile(n_rows, vocab_size, tile_tokens):
    """Rows (of PACK tokens) per grid step: multiple of 8, one-hot VMEM-budget aware,
    and capped so the grid has >=2 steps (v7x megacore) whenever possible."""
    want = max(8, _round_up(max(tile_tokens, PACK) // PACK, 8))
    # Keep the (PACK*Rt, V) bf16 one-hot within ~4 MiB.
    budget = max(8, ((4 * 1024 * 1024) // (2 * PACK * max(vocab_size, 1))) // 8 * 8)
    half = max(8, _round_up(-(-n_rows // 2), 8))          # ceil(n_rows / 2), rounded up
    return max(8, min(want, budget, half))


def _build_call(n_rows_padded, row_tile, vocab_size, n_embd, const_pipeline_mode):
    if const_pipeline_mode is None:
        tbl_spec = pl.BlockSpec((vocab_size, n_embd), lambda i: (0, 0))
    else:
        tbl_spec = pl.BlockSpec((vocab_size, n_embd), lambda i: (0, 0),
                                pipeline_mode=const_pipeline_mode)
    return pl.pallas_call(
        normalized_embedding_kernel,
        out_shape=jax.ShapeDtypeStruct((n_rows_padded, PACK * n_embd), jnp.float32),
        grid_spec=pltpu.PrefetchScalarGridSpec(
            num_scalar_prefetch=0,
            grid=(n_rows_padded // row_tile,),
            in_specs=[pl.BlockSpec((row_tile, PACK), lambda i: (i, 0)), tbl_spec],
            out_specs=pl.BlockSpec((row_tile, PACK * n_embd), lambda i: (i, 0)),
        ),
        compiler_params=pltpu.CompilerParams(
            dimension_semantics=("parallel",),
            vmem_limit_bytes=_vmem_limit_bytes()),
    )


def normalized_embedding(tokens, embedding_weight, *, tile_tokens=2048):
    """Pallas forward of NormalizedEmbedding: embedding_weight[tokens] / ||.||_2."""
    vocab_size, n_embd = embedding_weight.shape
    orig_shape = tuple(tokens.shape)
    m = int(np.prod(orig_shape)) if orig_shape else 1

    flat = tokens.reshape(-1).astype(jnp.int32)
    n_rows = -(-max(m, 1) // PACK)
    row_tile = _pick_row_tile(n_rows, vocab_size, tile_tokens)
    n_rows_padded = _round_up(n_rows, row_tile)

    pad = n_rows_padded * PACK - m
    if pad:
        flat = jnp.pad(flat, (0, pad))          # padded ids gather row 0, sliced off below
    ids = flat.reshape(n_rows_padded, PACK)

    # bf16 weight storage (halved HBM/VMEM bytes, native MXU bf16); f32 accumulation.
    tbl = embedding_weight.astype(jnp.bfloat16)

    try:
        out = _build_call(n_rows_padded, row_tile, vocab_size, n_embd,
                          const_pipeline_mode=pl.Buffered(1))(ids, tbl)
    except Exception:
        # Conservative fallback: identical kernel with the default double-buffered
        # constant-table spec (only the VMEM footprint of the table changes).
        out = _build_call(n_rows_padded, row_tile, vocab_size, n_embd,
                          const_pipeline_mode=None)(ids, tbl)

    return out.reshape(n_rows_padded * PACK, n_embd)[:m].reshape(*orig_shape, n_embd)


def reference_forward(tokens, embedding_weight, weight_dtype=jnp.bfloat16):
    """Pure-JAX mirror of the PyTorch module, using the same weight-storage dtype
    as the kernel (pass weight_dtype=jnp.float32 for the un-rounded reference)."""
    w = embedding_weight.astype(weight_dtype).astype(jnp.float32)
    v = w[tokens]
    return v / jnp.linalg.norm(v, axis=-1, keepdims=True)


if __name__ == "__main__":
    vocab_size, n_embd = 16, 32
    key = jax.random.PRNGKey(0)
    k_w, k_a, k_b = jax.random.split(key, 3)
    weight = jax.random.normal(k_w, (vocab_size, n_embd), jnp.float32)

    # Small config: (B, T, N) = (2, 8, 4) token grid -> 64 tokens, 2 grid steps.
    tokens = jax.random.randint(k_a, (2, 8, 4), 0, vocab_size, dtype=jnp.int32)
    out = jax.block_until_ready(normalized_embedding(tokens, weight))
    assert out.shape == (2, 8, 4, n_embd)

    ref = reference_forward(tokens, weight)                       # bf16-stored weights
    np.testing.assert_allclose(np.asarray(out), np.asarray(ref), rtol=1e-5, atol=1e-5)
    ref_f32 = reference_forward(tokens, weight, weight_dtype=jnp.float32)
    np.testing.assert_allclose(np.asarray(out), np.asarray(ref_f32), rtol=0.0, atol=2e-2)

    # Exercise row padding + a multi-step grid: 70 tokens (not a multiple of PACK or
    # of the tile), tile_tokens=32 -> row_tile=8, grid=3, 26 padded token slots.
    tokens2 = jax.random.randint(k_b, (2, 7, 5), 0, vocab_size, dtype=jnp.int32)
    out2 = jax.block_until_ready(normalized_embedding(tokens2, weight, tile_tokens=32))
    assert out2.shape == (2, 7, 5, n_embd)
    ref2 = reference_forward(tokens2, weight)
    np.testing.assert_allclose(np.asarray(out2), np.asarray(ref2), rtol=1e-5, atol=1e-5)

    print("KERNEL_OK")
</pallas_src>

<mosaic_0001>
module attributes {stable_mosaic.version = 11 : i64} {
  func.func @normalized_embedding_kernel(%arg0: i32, %arg1: memref<8x4xi32, #tpu.memory_space<vmem>>, %arg2: memref<16x32xbf16, #tpu.memory_space<vmem>>, %arg3: memref<8x128xf32, #tpu.memory_space<vmem>>) attributes {dimension_semantics = [#tpu.dimension_semantics<parallel>], iteration_bounds = array<i64: 2>, scalar_prefetch = 0 : i64, scratch_operands = 0 : i64, tpu.core_type = #tpu.core_type<tc>, window_params = [{transform_indices = @transform_0, window_bounds = array<i64: 8, 4>}, {pipeline_mode = #tpu.pipeline_mode<synchronous>, transform_indices = @transform_1, window_bounds = array<i64: 16, 32>}, {transform_indices = @transform_2, window_bounds = array<i64: 8, 128>}]} {
    %c0 = arith.constant 0 : index
    %c0_0 = arith.constant 0 : index
    %0 = vector.load %arg1[%c0, %c0_0] : memref<8x4xi32, #tpu.memory_space<vmem>>, vector<8x4xi32>
    %c0_i32 = arith.constant 0 : i32
    %c15_i32 = arith.constant 15 : i32
    %1 = vector.broadcast %c0_i32 : i32 to vector<8x4xi32>
    %2 = arith.maxsi %1, %0 : vector<8x4xi32>
    %3 = vector.broadcast %c15_i32 : i32 to vector<8x4xi32>
    %4 = arith.minsi %3, %2 : vector<8x4xi32>
    %5 = vector.extract_strided_slice %4 {offsets = [0, 0], sizes = [8, 1], strides = [1, 1]} : vector<8x4xi32> to vector<8x1xi32>
    %6 = vector.extract_strided_slice %4 {offsets = [0, 1], sizes = [8, 1], strides = [1, 1]} : vector<8x4xi32> to vector<8x1xi32>
    %7 = vector.extract_strided_slice %4 {offsets = [0, 2], sizes = [8, 1], strides = [1, 1]} : vector<8x4xi32> to vector<8x1xi32>
    %8 = vector.extract_strided_slice %4 {offsets = [0, 3], sizes = [8, 1], strides = [1, 1]} : vector<8x4xi32> to vector<8x1xi32>
    %9 = tpu.concatenate %5, %6, %7, %8 in 0 : vector<8x1xi32>, vector<8x1xi32>, vector<8x1xi32>, vector<8x1xi32> -> vector<32x1xi32>
    %10 = tpu.iota {dimensions = array<i32: 1>} : vector<32x16xi32>
    %11 = vector.broadcast %9 : vector<32x1xi32> to vector<32x16xi32>
    %12 = arith.cmpi eq, %11, %10 : vector<32x16xi32>
    %13 = arith.extui %12 : vector<32x16xi1> to vector<32x16xi32>
    %14 = arith.sitofp %13 : vector<32x16xi32> to vector<32x16xf32>
    %15 = arith.truncf %14 : vector<32x16xf32> to vector<32x16xbf16>
    %c0_1 = arith.constant 0 : index
    %c0_2 = arith.constant 0 : index
    %16 = vector.load %arg2[%c0_1, %c0_2] : memref<16x32xbf16, #tpu.memory_space<vmem>>, vector<16x32xbf16>
    %cst = arith.constant dense<0.000000e+00> : vector<32x32xf32>
    %17 = tpu.matmul %15, %16, %cst {dimension_numbers = #tpu.dot_dimension_numbers<[1], [0], [0], [1], [0, 0, 1, 1], [], []>} : vector<32x16xbf16>, vector<16x32xbf16>, vector<32x32xf32> -> vector<32x32xf32>
    %18 = arith.mulf %17, %17 : vector<32x32xf32>
    %cst_3 = arith.constant dense<0.000000e+00> : vector<32xf32>
    %19 = vector.multi_reduction <add>, %18, %cst_3 [1] : vector<32x32xf32> to vector<32xf32>
    %20 = vector.shape_cast %19 : vector<32xf32> to vector<32x1xf32>
    %cst_4 = arith.constant 9.99999996E-13 : f32
    %21 = vector.broadcast %cst_4 : f32 to vector<32x1xf32>
    %22 = arith.addf %20, %21 : vector<32x1xf32>
    %23 = math.rsqrt %22 : vector<32x1xf32>
    %24 = vector.broadcast %23 : vector<32x1xf32> to vector<32x32xf32>
    %25 = arith.mulf %17, %24 : vector<32x32xf32>
    %26 = vector.extract_strided_slice %25 {offsets = [0, 0], sizes = [8, 32], strides = [1, 1]} : vector<32x32xf32> to vector<8x32xf32>
    %27 = vector.extract_strided_slice %25 {offsets = [8, 0], sizes = [8, 32], strides = [1, 1]} : vector<32x32xf32> to vector<8x32xf32>
    %28 = vector.extract_strided_slice %25 {offsets = [16, 0], sizes = [8, 32], strides = [1, 1]} : vector<32x32xf32> to vector<8x32xf32>
    %29 = vector.extract_strided_slice %25 {offsets = [24, 0], sizes = [8, 32], strides = [1, 1]} : vector<32x32xf32> to vector<8x32xf32>
    %30 = tpu.concatenate %26, %27, %28, %29 in 1 : vector<8x32xf32>, vector<8x32xf32>, vector<8x32xf32>, vector<8x32xf32> -> vector<8x128xf32>
    %c0_5 = arith.constant 0 : index
    %c0_6 = arith.constant 0 : index
    %31 = vector.load %arg3[%c0_5, %c0_6] : memref<8x128xf32, #tpu.memory_space<vmem>>, vector<8x128xf32>
    tpu.vector_store %arg3[%c0_5, %c0_6], %30 {strides = array<i32>} : memref<8x128xf32, #tpu.memory_space<vmem>>, vector<8x128xf32>,
    return
  }
  func.func @transform_0(%arg0: i32) -> (i32, i32) {
    %c0_i32 = arith.constant 0 : i32
    %c0_i32_0 = arith.constant 0 : i32
    return %arg0, %c0_i32 : i32, i32
  }
  func.func @transform_1(%arg0: i32) -> (i32, i32) {
    %c0_i32 = arith.constant 0 : i32
    %c0_i32_0 = arith.constant 0 : i32
    %c0_i32_1 = arith.constant 0 : i32
    return %c0_i32, %c0_i32_0 : i32, i32
  }
  func.func @transform_2(%arg0: i32) -> (i32, i32) {
    %c0_i32 = arith.constant 0 : i32
    %c0_i32_0 = arith.constant 0 : i32
    return %arg0, %c0_i32 : i32, i32
  }
}

module attributes {stable_mosaic.version = 11 : i64} {
  func.func @normalized_embedding_kernel(%arg0: i32, %arg1: memref<8x4xi32, #tpu.memory_space<vmem>>, %arg2: memref<16x32xbf16, #tpu.memory_space<vmem>>, %arg3: memref<8x128xf32, #tpu.memory_space<vmem>>) attributes {dimension_semantics = [#tpu.dimension_semantics<parallel>], iteration_bounds = array<i64: 2>, scalar_prefetch = 0 : i64, scratch_operands = 0 : i64, tpu.core_type = #tpu.core_type<tc>, window_params = [{transform_indices = @transform_0, window_bounds = array<i64: 8, 4>}, {pipeline_mode = #tpu.pipeline_mode<synchronous>, transform_indices = @transform_1, window_bounds = array<i64: 16, 32>}, {transform_indices = @transform_2, window_bounds = array<i64: 8, 128>}]} {
    %c0 = arith.constant 0 : index
    %c0_0 = arith.constant 0 : index
    %0 = vector.load %arg1[%c0, %c0_0] : memref<8x4xi32, #tpu.memory_space<vmem>>, vector<8x4xi32>
    %c0_i32 = arith.constant 0 : i32
    %c15_i32 = arith.constant 15 : i32
    %1 = vector.broadcast %c0_i32 : i32 to vector<8x4xi32>
    %2 = arith.maxsi %1, %0 : vector<8x4xi32>
    %3 = vector.broadcast %c15_i32 : i32 to vector<8x4xi32>
    %4 = arith.minsi %3, %2 : vector<8x4xi32>
    %5 = vector.extract_strided_slice %4 {offsets = [0, 0], sizes = [8, 1], strides = [1, 1]} : vector<8x4xi32> to vector<8x1xi32>
    %6 = vector.extract_strided_slice %4 {offsets = [0, 1], sizes = [8, 1], strides = [1, 1]} : vector<8x4xi32> to vector<8x1xi32>
    %7 = vector.extract_strided_slice %4 {offsets = [0, 2], sizes = [8, 1], strides = [1, 1]} : vector<8x4xi32> to vector<8x1xi32>
    %8 = vector.extract_strided_slice %4 {offsets = [0, 3], sizes = [8, 1], strides = [1, 1]} : vector<8x4xi32> to vector<8x1xi32>
    %9 = tpu.concatenate %5, %6, %7, %8 in 0 : vector<8x1xi32>, vector<8x1xi32>, vector<8x1xi32>, vector<8x1xi32> -> vector<32x1xi32>
    %10 = tpu.iota {dimensions = array<i32: 1>} : vector<32x16xi32>
    %11 = vector.broadcast %9 : vector<32x1xi32> to vector<32x16xi32>
    %12 = arith.cmpi eq, %11, %10 : vector<32x16xi32>
    %13 = arith.extui %12 : vector<32x16xi1> to vector<32x16xi32>
    %14 = arith.sitofp %13 : vector<32x16xi32> to vector<32x16xf32>
    %15 = arith.truncf %14 : vector<32x16xf32> to vector<32x16xbf16>
    %c0_1 = arith.constant 0 : index
    %c0_2 = arith.constant 0 : index
    %16 = vector.load %arg2[%c0_1, %c0_2] : memref<16x32xbf16, #tpu.memory_space<vmem>>, vector<16x32xbf16>
    %cst = arith.constant dense<0.000000e+00> : vector<32x32xf32>
    %17 = tpu.matmul %15, %16, %cst {dimension_numbers = #tpu.dot_dimension_numbers<[1], [0], [0], [1], [0, 0, 1, 1], [], []>} : vector<32x16xbf16>, vector<16x32xbf16>, vector<32x32xf32> -> vector<32x32xf32>
    %18 = arith.mulf %17, %17 : vector<32x32xf32>
    %cst_3 = arith.constant dense<0.000000e+00> : vector<32xf32>
    %19 = vector.multi_reduction <add>, %18, %cst_3 [1] : vector<32x32xf32> to vector<32xf32>
    %20 = vector.shape_cast %19 : vector<32xf32> to vector<32x1xf32>
    %cst_4 = arith.constant 9.99999996E-13 : f32
    %21 = vector.broadcast %cst_4 : f32 to vector<32x1xf32>
    %22 = arith.addf %20, %21 : vector<32x1xf32>
    %23 = math.rsqrt %22 : vector<32x1xf32>
    %24 = vector.broadcast %23 : vector<32x1xf32> to vector<32x32xf32>
    %25 = arith.mulf %17, %24 : vector<32x32xf32>
    %26 = vector.extract_strided_slice %25 {offsets = [0, 0], sizes = [8, 32], strides = [1, 1]} : vector<32x32xf32> to vector<8x32xf32>
    %27 = vector.extract_strided_slice %25 {offsets = [8, 0], sizes = [8, 32], strides = [1, 1]} : vector<32x32xf32> to vector<8x32xf32>
    %28 = vector.extract_strided_slice %25 {offsets = [16, 0], sizes = [8, 32], strides = [1, 1]} : vector<32x32xf32> to vector<8x32xf32>
    %29 = vector.extract_strided_slice %25 {offsets = [24, 0], sizes = [8, 32], strides = [1, 1]} : vector<32x32xf32> to vector<8x32xf32>
    %30 = tpu.concatenate %26, %27, %28, %29 in 1 : vector<8x32xf32>, vector<8x32xf32>, vector<8x32xf32>, vector<8x32xf32> -> vector<8x128xf32>
    %c0_5 = arith.constant 0 : index
    %c0_6 = arith.constant 0 : index
    %31 = vector.load %arg3[%c0_5, %c0_6] : memref<8x128xf32, #tpu.memory_space<vmem>>, vector<8x128xf32>
    tpu.vector_store %arg3[%c0_5, %c0_6], %30 {strides = array<i32>} : memref<8x128xf32, #tpu.memory_space<vmem>>, vector<8x128xf32>,
    return
  }
  func.func @transform_0(%arg0: i32) -> (i32, i32) {
    %c0_i32 = arith.constant 0 : i32
    %c0_i32_0 = arith.constant 0 : i32
    return %arg0, %c0_i32 : i32, i32
  }
  func.func @transform_1(%arg0: i32) -> (i32, i32) {
    %c0_i32 = arith.constant 0 : i32
    %c0_i32_0 = arith.constant 0 : i32
    %c0_i32_1 = arith.constant 0 : i32
    return %c0_i32, %c0_i32_0 : i32, i32
  }
  func.func @transform_2(%arg0: i32) -> (i32, i32) {
    %c0_i32 = arith.constant 0 : i32
    %c0_i32_0 = arith.constant 0 : i32
    return %arg0, %c0_i32 : i32, i32
  }
}

</mosaic_0001>

<bundles_post_ra>
// kernel: tpu_custom_call.1
= control target key start
LH: loop header
LB: loop body
LE: loop exit
PB: predicated region body
PF: predicated region fallthrough
CT: control target
= control target key end

     0   :  { %7 = vsyncpa [#allocation3], 0  ;;  %s643_s0 = inlined_call_operand.vmem [shape: s32[16,4], index: 0, kind: input, shape index: {}]   ;;  %s644_s1 = inlined_call_operand.vmem [shape: bf16[16,32], index: 1, kind: input, shape index: {}]   ;;  %s645_s2 = inlined_call_operand.hbm [shape: f32[16,128], index: 2, kind: output, shape index: {}]  }
   0x1   :  { %9 = vsyncpa [#allocation3 + $0x1], 0  ;;  %s535_s9 = smov 0   ;;  %s537_s10 = smov 0  }
   0x2   :  { %s539_s11 = smov 0   ;;  %s541_s12 = smov 0  }
   0x3 LB: > { %s556_s13 = sadd.s32 4294967295, %s509_s12   ;;  %s363_s14 = sadd.s32 4294967294, %s509_s12   ;;  %s509_s12 = sphi %s541_s12, %s651_s12   ;;  %s505_s11 = sphi %s539_s11, %s650_s11   ;;  %s501_s10 = sphi %s537_s10, %s649_s10   ;;  %s497_s9 = sphi %s535_s9, %s648_s9  }
   0x4   : > { %s560_s15 = sadd.s32 1, %s509_s12   ;;  %s69_s16 = sadd.s32 1, %s505_s11 }
   0x5   : > { %s66_s17 = ssub.s32 %s509_s12, %s560_s15  ;;  %p79_p0 = scmp.ne.s32.totalorder %s505_s11, %s501_s10 }
   0x6   : > { %p67_p1 = scmp.eq.s32.totalorder %s66_s17, 0  ;;  %p80_p2 = scmp.eq.s32.totalorder %s556_s13, 1 }
   0x7   : > { %p85_p3 = scmp.ne.s32.totalorder %s501_s10, %s497_s9  ;;  %p86_p4 = scmp.eq.s32.totalorder %s363_s14, 1 }
   0x8   : > { %s571_s18 = scalar_select %p67_p1, %s505_s11, %s69_s16  }
   0x9   : > { %p573_p5 = por %p80_p2, %p79_p0  ;;  %p577_p6 = por %p86_p4, %p85_p3 }
   0xa   : > { %p366_p7 = scmp.ge.s32.totalorder %s509_s12, 1  ;;  %p114_p8 = scmp.lt.s32.totalorder %s509_s12, 3 }
   0xc   : > { %p115_p9 = pnand %p366_p7, %p114_p8 }
   0xd   : > { %p135_p10 = scmp.lt.s32.totalorder (!%p115_p9), %s556_s13, 1  ;;  %v511_v0 = vmov (!%p115_p9), 0   ;;  %s512_s26 = smov (!%p115_p9), 127   ;;  %v438_v7 = vld [vmem:[%s644_s1] sm:$0xff] (!%p115_p9)   ;;  %v151_v8 = vlaneseq (!%p115_p9)  ;;  %v515_v11 = vmov (!%p115_p9), 0.0   ;;  %vm187_vm4 = vcmask (!%p115_p9), 130048  }
   0xe   : > { %118 = sbr.rel (%p115_p9) target bundleno = 794 (0x31a), region = 28  ;;  %437 = vset.pattern.permute.xlu0 (!%p115_p9), %v511_v0  ;;  %436 = vset.pattern.permute.xlu1 (!%p115_p9), %v511_v0  ;;  %s513_s27 = smov (!%p115_p9), 125   ;;  %vm247_vm7 = vcmask (!%p115_p9), 261120   ;;  %vm285_vm8 = vcmask (!%p115_p9), 523264   ;;  %vm287_vm9 = vcmask (!%p115_p9), 785408  }
   0xf   : > { %s514_s28 = smov (!%p115_p9), 126   ;;  %383 = vmatprep.subr.bf16.mxu0 (!%p115_p9), %v438_v7  ;;  %v152_v9 = vand.u32 (!%p115_p9), 127, %v151_v8  ;;  %s516_s3 = smov (!%p115_p9), 64  }
  0x10   : > { %384 = vmatpush3.bf16.msra.mxu0 (!%p115_p9), %v438_v7  ;;  %s517_s4 = smov (!%p115_p9), 32   ;;  %s518_s5 = smov (!%p115_p9), 96  }
  0x11   : > { %s132_s6 = sand.u32 (!%p115_p9), 1, %s501_s10   ;;  %s377_s8 = sshll.u32 (!%p115_p9), %s556_s13, 7 }
  0x12   : > { %s367_s7 = sshll.u32 (!%p115_p9), %s132_s6, 3  ;;  %s291_s23 = scalar_lea.sflag (!%p115_p9), [#allocation3], %s132_s6 }
  0x13   : > { %s134_s14 = scalar_lea.vmem (!%p115_p9), [#allocation2], %s367_s7  ;;  %s519_s24 = smov (!%p115_p9), [#allocation2]  }
  0x14   : > { %s304_s16 = sshll.u32 (!%p115_p9), %s134_s14, 4  ;;  %s603_s16 = int_to_ptr.vmem [resolvable:$true] %s304_s16 }
  0x15   : > { %s136_s21 = scalar_select %p135_p10, %s556_s13, 1 }
  0x16   : > { %s447_s13 = scalar_lea.vmem %s603_s16, 128 }
  0x17   : > { %s368_s22 = sshll.u32 %s136_s21, 3  ;;  %p448_p11 = scmp.ne.s32.totalorder %s603_s16, %s447_s13 }
  0x18   : > { %s138_s25 = scalar_lea.vmem %s643_s0, %s368_s22  ;;  %s601_s22 = scalar_lea.hbm %s645_s2, %s377_s8 }
  0x19   : > { %v140_v1 = vld [vmem:[%s138_s25] sm:$0xff]  ;;  %p449_p12 = pnand %p448_p11, %p573_p5  ;;  %s451_s25 = sshll.u32 %s519_s24, 4  ;;  %s452_s25 = int_to_ptr.vmem [resolvable:$false] %s451_s25 }
  0x1a   : > { %vm141_vm0 = vcmp.gt.s32.totalorder %v140_v1, 0  ;;  %p454_p0 = scmp.lt.s32.totalorder %s603_s16, %s452_s25 }
  0x1b   : > { %v142_v2 = vsel %vm141_vm0, %v140_v1, 0  ;;  %p450_p13 = pneg %p449_p12 }
  0x1c   : > { %vm143_vm1 = vcmp.lt.s32.totalorder %v142_v2, 15 }
  0x1d   : > { %v144_v3 = vsel %vm143_vm1, %v142_v2, 15 }
  0x1e   : > { %145 = vrot.lane.b32.xlu0 %v144_v3, %s512_s26  ;;  %149 = vrot.lane.b32.xlu1 %v144_v3, %s513_s27  ;;  %s453_s26 = scalar_lea.vmem %s452_s25, 256 }
  0x1f   : > { %p455_p1 = scmp.lt.s32.totalorder %s453_s26, %s447_s13 }
  0x21   : > { %p456_p2 = por %p455_p1, %p454_p0 }
  0x22   : > { %147 = vrot.lane.b32.xlu0 %v144_v3, %s514_s28  ;;  %154 = vperm.xlu1 %436, %v144_v3  }
  0x23   : > { %p457_p3 = pnand %p456_p2, %p450_p13 }
  0x90   : > { %v146_v4 = vpop.permute.xlu0 %145  ;;  %v150_v6 = vpop.permute.xlu1 %149 }
  0x91   : > { %157 = vperm.xlu0 %437, %v146_v4  }
  0x94   : > { %v148_v5 = vpop.permute.xlu0 %147 }
  0x95   : > { %160 = vperm.xlu1 %436, %v148_v5  }
  0x99   : > { %163 = vperm.xlu1 %436, %v150_v6  }
  0xa1   : > { %v155_v10 = vpop.permute.xlu1 %154 }
  0xa2   : > { %vm165_vm2 = vcmp.eq.s32.totalorder %v155_v10, %v152_v9 }
  0xa3   : > { %v369_v12 = vsel %vm165_vm2, 1.0, %v515_v11 }
 0x110   : > { %v158_v13 = vpop.permute.xlu0 %157 }
 0x111   : > { %vm166_vm3 = vcmp.eq.s32.totalorder %v158_v13, %v152_v9 }
 0x112   : > { %v370_v14 = vsel %vm166_vm3, 1.0, %v515_v11 }
 0x113   : > { %v177_v15 = vpack.c.bf16 %v370_v14, %v369_v12 }
 0x114   : > { %v161_v16 = vpop.permute.xlu1 %160 }
 0x115   : > { %385 = vmatprep.mubr.msk.bf16.mxu0 %vm187_vm4, %v177_v15  ;;  %vm167_vm5 = vcmp.eq.s32.totalorder %v161_v16, %v152_v9 }
 0x116   : > { %v371_v18 = vsel %vm167_vm5, 1.0, %v515_v11 }
 0x118   : > { %v164_v17 = vpop.permute.xlu1 %163 }
 0x119   : > { %vm168_vm6 = vcmp.eq.s32.totalorder %v164_v17, %v152_v9 }
 0x11a   : > { %v372_v19 = vsel %vm168_vm6, 1.0, %v515_v11 }
 0x11b   : > { %v178_v20 = vpack.c.bf16 %v372_v19, %v371_v18 }
 0x11d   : > { %386 = vmatmul.mubr.msk.bf16.vlgmr.msra.gmra.mrb[0].mxu0 %vm187_vm4, %v178_v20 }
 0x1f0   : > { %v387_v21 = vpop.f32.mrb[0].mxu0 }
 0x1f1   : > { %v245_v22 = vmul.f32 %v387_v21, %v387_v21  ;;  %v228_v23 = vpop.f32.mrb[1].mxu0 }
 0x1f2   : > { %v388_v24 = vpop.f32.mrb[2].mxu0  ;;  %v243_v30 = vmul.f32 %v228_v23, %v228_v23 }
 0x1f3   : > { %v231_v25 = vpop.f32.mrb[3].mxu0  ;;  %v254_v26 = vsel %vm247_vm7, %v245_v22, 0.0  ;;  %v246_v28 = vmul.f32 %v388_v24, %v388_v24 }
 0x1f4   : > { %v244_v27 = vmul.f32 %v231_v25, %v231_v25  ;;  %255 = vadd.xlane.f32.xlu1 %v254_v26  ;;  %v248_v32 = vsel %vm247_vm7, %v243_v30, 0.0 }
 0x1f5   : > { %v257_v31 = vsel %vm247_vm7, %v246_v28, 0.0 }
 0x1f6   : > { %v251_v29 = vsel %vm247_vm7, %v244_v27, 0.0 }
 0x1f7   : > { %252 = vadd.xlane.f32.xlu0 %v251_v29 }
 0x1fb   : > { %258 = vadd.xlane.f32.xlu0 %v257_v31 }
 0x1ff   : > { %249 = vadd.xlane.f32.xlu0 %v248_v32 }
 0x281   : > { %v256_v33 = vpop.xlane.xlu1 %255 }
 0x282   : > { %v262_v34 = vadd.f32 1e-12, %v256_v33 }
 0x284   : > { %439 = vrsqrt.f32 %v262_v34  ;;  %v253_v35 = vpop.xlane.xlu0 %252 }
 0x285   : > { %v261_v36 = vadd.f32 1e-12, %v253_v35 }
 0x287   : > { %441 = vrsqrt.f32 %v261_v36 }
 0x288   : > { %v259_v37 = vpop.xlane.xlu0 %258 }
 0x289   : > { %v263_v38 = vadd.f32 1e-12, %v259_v37 }
 0x28b   : > { %443 = vrsqrt.f32 %v263_v38 }
 0x28c   : > { %v250_v45 = vpop.xlane.xlu0 %249 }
 0x28d   : > { %v260_v46 = vadd.f32 1e-12, %v250_v45 }
 0x28e   : > { %v440_v39 = vpop.eup %439 }
 0x28f   : > { %v270_v40 = vmul.f32 %v440_v39, %v387_v21  ;;  %445 = vrsqrt.f32 %v260_v46 }
 0x291   : > { %v442_v41 = vpop.eup %441  ;;  %277 = vrot.lane.b32.xlu0 %v270_v40, %s516_s3 }
 0x292   : > { %v269_v42 = vmul.f32 %v442_v41, %v231_v25 }
 0x294   : > { %273 = vrot.lane.b32.xlu1 %v269_v42, %s517_s4 }
 0x295   : > { %v444_v43 = vpop.eup %443 }
 0x296   : > { %v271_v44 = vmul.f32 %v444_v43, %v388_v24 }
 0x298   : > { %281 = vrot.lane.b32.xlu1 %v271_v44, %s518_s5 }
 0x299   : > { %v446_v47 = vpop.eup %445 }
 0x29a   : > { %v268_v48 = vmul.f32 %v446_v47, %v228_v23 }
 0x303   : > { %v278_v51 = vpop.permute.xlu0 %277 }
 0x306   : > { %v274_v49 = vpop.permute.xlu1 %273 }
 0x307   : > { %v284_v50 = vsel %vm247_vm7, %v268_v48, %v274_v49 }
 0x308   : > { %v286_v53 = vsel %vm285_vm8, %v284_v50, %v278_v51 }
 0x30a   : > { %v282_v52 = vpop.permute.xlu1 %281 }
 0x30b   : > { %v288_v54 = vsel %vm287_vm9, %v286_v53, %v282_v52 }
 0x30c   : > { %289 = vst [vmem:[%s134_s14] sm:$0xff] %v288_v54 }
 0x30d   : > { %460 = shalt.err (!%p457_p3)
}
 0x30e   : > { %s461_s27 = scalar_lea.hbm %s601_s22, 128  ;;  %s465_s30 = scalar_lea.hbm %s645_s2, 256 }
 0x30f   : > { %p462_p4 = scmp.ne.s32.totalorder %s601_s22, %s461_s27  ;;  %p466_p9 = scmp.lt.u32.totalorder %s601_s22, %s645_s2 }
 0x310   : > { %p467_p10 = scmp.lt.u32.totalorder %s465_s30, %s461_s27  ;;  %p469_p12 = scmp.lt.u32.totalorder %s461_s27, %s601_s22 }
 0x311   : > { %p463_p7 = pnand %p462_p4, %p573_p5 }
 0x312   : > { %p468_p11 = por %p467_p10, %p466_p9 }
 0x313   : > { %p464_p8 = pneg %p463_p7 }
 0x314   : > { %p470_p13 = por %p469_p12, %p468_p11 }
 0x316   : > { %p471_p0 = pnand %p470_p13, %p464_p8 }
 0x318   : > { %474 = shalt.err (!%p471_p0)
}
 0x319   : > { %389 = dma.vmem_to_hbm [thread:$0]  (%p573_p5), %s603_s16, 128, %s601_s22, %s291_s23  }
 0x31a PF: > { %p395_p1 = scmp.ge.s32.totalorder %s509_s12, 2  ;;  %s316_s5 = sand.u32 1, %s497_s9  }
 0x31b   : > { %s317_s6 = scalar_lea.sflag [#allocation3], %s316_s5 }
 0x31c   : > { %p392_p2 = pnand %p395_p1, %p577_p6 }
 0x31e   : > { %492 = dma.done.wait (!%p392_p2), %s317_s6, 128  }
 0x31f   : > { %494 = vsyncadd (!%p392_p2), %s317_s6, 4294967168  ;;  %p12_p3 = scmp.ge.s32.totalorder %s560_s15, 4   ;;  %s648_s9 = smov %s501_s10 }
 0x320   : > { %s649_s10 = smov %s505_s11  ;;  %s650_s11 = smov %s571_s18 }
 0x321   : > { %s651_s12 = smov %s560_s15  ;;  %14 = sbr.rel (!%p12_p3) target bundleno = 3 (0x3), region = 63 }
 0x328   :  { %322 = vsyncpa [#allocation3], 1 }
 0x329   :  { %324 = vsyncpa [#allocation3 + $0x1], 1 }

// kernel: tpu_custom_call.1
= control target key start
LH: loop header
LB: loop body
LE: loop exit
PB: predicated region body
PF: predicated region fallthrough
CT: control target
= control target key end

     0   :  { %7 = vsyncpa [#allocation3], 0  ;;  %s643_s0 = inlined_call_operand.vmem [shape: s32[16,4], index: 0, kind: input, shape index: {}]   ;;  %s644_s1 = inlined_call_operand.vmem [shape: bf16[16,32], index: 1, kind: input, shape index: {}]   ;;  %s645_s2 = inlined_call_operand.hbm [shape: f32[16,128], index: 2, kind: output, shape index: {}]  }
   0x1   :  { %9 = vsyncpa [#allocation3 + $0x1], 0  ;;  %s535_s9 = smov 0   ;;  %s537_s10 = smov 0  }
   0x2   :  { %s539_s11 = smov 0   ;;  %s541_s12 = smov 0  }
   0x3 LB: > { %s556_s13 = sadd.s32 4294967295, %s509_s12   ;;  %s363_s14 = sadd.s32 4294967294, %s509_s12   ;;  %s509_s12 = sphi %s541_s12, %s651_s12   ;;  %s505_s11 = sphi %s539_s11, %s650_s11   ;;  %s501_s10 = sphi %s537_s10, %s649_s10   ;;  %s497_s9 = sphi %s535_s9, %s648_s9  }
   0x4   : > { %s560_s15 = sadd.s32 1, %s509_s12   ;;  %s69_s16 = sadd.s32 1, %s505_s11 }
   0x5   : > { %s66_s17 = ssub.s32 %s509_s12, %s560_s15  ;;  %p79_p0 = scmp.ne.s32.totalorder %s505_s11, %s501_s10 }
   0x6   : > { %p67_p1 = scmp.eq.s32.totalorder %s66_s17, 0  ;;  %p80_p2 = scmp.eq.s32.totalorder %s556_s13, 1 }
   0x7   : > { %p85_p3 = scmp.ne.s32.totalorder %s501_s10, %s497_s9  ;;  %p86_p4 = scmp.eq.s32.totalorder %s363_s14, 1 }
   0x8   : > { %s571_s18 = scalar_select %p67_p1, %s505_s11, %s69_s16  }
   0x9   : > { %p573_p5 = por %p80_p2, %p79_p0  ;;  %p577_p6 = por %p86_p4, %p85_p3 }
   0xa   : > { %p366_p7 = scmp.ge.s32.totalorder %s509_s12, 1  ;;  %p114_p8 = scmp.lt.s32.totalorder %s509_s12, 3 }
   0xc   : > { %p115_p9 = pnand %p366_p7, %p114_p8 }
   0xd   : > { %p135_p10 = scmp.lt.s32.totalorder (!%p115_p9), %s556_s13, 1  ;;  %v511_v0 = vmov (!%p115_p9), 0   ;;  %s512_s26 = smov (!%p115_p9), 127   ;;  %v438_v7 = vld [vmem:[%s644_s1] sm:$0xff] (!%p115_p9)   ;;  %v151_v8 = vlaneseq (!%p115_p9)  ;;  %v515_v11 = vmov (!%p115_p9), 0.0   ;;  %vm187_vm4 = vcmask (!%p115_p9), 130048  }
   0xe   : > { %118 = sbr.rel (%p115_p9) target bundleno = 794 (0x31a), region = 28  ;;  %437 = vset.pattern.permute.xlu0 (!%p115_p9), %v511_v0  ;;  %436 = vset.pattern.permute.xlu1 (!%p115_p9), %v511_v0  ;;  %s513_s27 = smov (!%p115_p9), 125   ;;  %vm247_vm7 = vcmask (!%p115_p9), 261120   ;;  %vm285_vm8 = vcmask (!%p115_p9), 523264   ;;  %vm287_vm9 = vcmask (!%p115_p9), 785408  }
   0xf   : > { %s514_s28 = smov (!%p115_p9), 126   ;;  %383 = vmatprep.subr.bf16.mxu0 (!%p115_p9), %v438_v7  ;;  %v152_v9 = vand.u32 (!%p115_p9), 127, %v151_v8  ;;  %s516_s3 = smov (!%p115_p9), 64  }
  0x10   : > { %384 = vmatpush3.bf16.msra.mxu0 (!%p115_p9), %v438_v7  ;;  %s517_s4 = smov (!%p115_p9), 32   ;;  %s518_s5 = smov (!%p115_p9), 96  }
  0x11   : > { %s132_s6 = sand.u32 (!%p115_p9), 1, %s501_s10   ;;  %s377_s8 = sshll.u32 (!%p115_p9), %s556_s13, 7 }
  0x12   : > { %s367_s7 = sshll.u32 (!%p115_p9), %s132_s6, 3  ;;  %s291_s23 = scalar_lea.sflag (!%p115_p9), [#allocation3], %s132_s6 }
  0x13   : > { %s134_s14 = scalar_lea.vmem (!%p115_p9), [#allocation2], %s367_s7  ;;  %s519_s24 = smov (!%p115_p9), [#allocation2]  }
  0x14   : > { %s304_s16 = sshll.u32 (!%p115_p9), %s134_s14, 4  ;;  %s603_s16 = int_to_ptr.vmem [resolvable:$true] %s304_s16 }
  0x15   : > { %s136_s21 = scalar_select %p135_p10, %s556_s13, 1 }
  0x16   : > { %s447_s13 = scalar_lea.vmem %s603_s16, 128 }
  0x17   : > { %s368_s22 = sshll.u32 %s136_s21, 3  ;;  %p448_p11 = scmp.ne.s32.totalorder %s603_s16, %s447_s13 }
  0x18   : > { %s138_s25 = scalar_lea.vmem %s643_s0, %s368_s22  ;;  %s601_s22 = scalar_lea.hbm %s645_s2, %s377_s8 }
  0x19   : > { %v140_v1 = vld [vmem:[%s138_s25] sm:$0xff]  ;;  %p449_p12 = pnand %p448_p11, %p573_p5  ;;  %s451_s25 = sshll.u32 %s519_s24, 4  ;;  %s452_s25 = int_to_ptr.vmem [resolvable:$false] %s451_s25 }
  0x1a   : > { %vm141_vm0 = vcmp.gt.s32.totalorder %v140_v1, 0  ;;  %p454_p0 = scmp.lt.s32.totalorder %s603_s16, %s452_s25 }
  0x1b   : > { %v142_v2 = vsel %vm141_vm0, %v140_v1, 0  ;;  %p450_p13 = pneg %p449_p12 }
  0x1c   : > { %vm143_vm1 = vcmp.lt.s32.totalorder %v142_v2, 15 }
  0x1d   : > { %v144_v3 = vsel %vm143_vm1, %v142_v2, 15 }
  0x1e   : > { %145 = vrot.lane.b32.xlu0 %v144_v3, %s512_s26  ;;  %149 = vrot.lane.b32.xlu1 %v144_v3, %s513_s27  ;;  %s453_s26 = scalar_lea.vmem %s452_s25, 256 }
  0x1f   : > { %p455_p1 = scmp.lt.s32.totalorder %s453_s26, %s447_s13 }
  0x21   : > { %p456_p2 = por %p455_p1, %p454_p0 }
  0x22   : > { %147 = vrot.lane.b32.xlu0 %v144_v3, %s514_s28  ;;  %154 = vperm.xlu1 %436, %v144_v3  }
  0x23   : > { %p457_p3 = pnand %p456_p2, %p450_p13 }
  0x90   : > { %v146_v4 = vpop.permute.xlu0 %145  ;;  %v150_v6 = vpop.permute.xlu1 %149 }
  0x91   : > { %157 = vperm.xlu0 %437, %v146_v4  }
  0x94   : > { %v148_v5 = vpop.permute.xlu0 %147 }
  0x95   : > { %160 = vperm.xlu1 %436, %v148_v5  }
  0x99   : > { %163 = vperm.xlu1 %436, %v150_v6  }
  0xa1   : > { %v155_v10 = vpop.permute.xlu1 %154 }
  0xa2   : > { %vm165_vm2 = vcmp.eq.s32.totalorder %v155_v10, %v152_v9 }
  0xa3   : > { %v369_v12 = vsel %vm165_vm2, 1.0, %v515_v11 }
 0x110   : > { %v158_v13 = vpop.permute.xlu0 %157 }
 0x111   : > { %vm166_vm3 = vcmp.eq.s32.totalorder %v158_v13, %v152_v9 }
 0x112   : > { %v370_v14 = vsel %vm166_vm3, 1.0, %v515_v11 }
 0x113   : > { %v177_v15 = vpack.c.bf16 %v370_v14, %v369_v12 }
 0x114   : > { %v161_v16 = vpop.permute.xlu1 %160 }
 0x115   : > { %385 = vmatprep.mubr.msk.bf16.mxu0 %vm187_vm4, %v177_v15  ;;  %vm167_vm5 = vcmp.eq.s32.totalorder %v161_v16, %v152_v9 }
 0x116   : > { %v371_v18 = vsel %vm167_vm5, 1.0, %v515_v11 }
 0x118   : > { %v164_v17 = vpop.permute.xlu1 %163 }
 0x119   : > { %vm168_vm6 = vcmp.eq.s32.totalorder %v164_v17, %v152_v9 }
 0x11a   : > { %v372_v19 = vsel %vm168_vm6, 1.0, %v515_v11 }
 0x11b   : > { %v178_v20 = vpack.c.bf16 %v372_v19, %v371_v18 }
 0x11d   : > { %386 = vmatmul.mubr.msk.bf16.vlgmr.msra.gmra.mrb[0].mxu0 %vm187_vm4, %v178_v20 }
 0x1f0   : > { %v387_v21 = vpop.f32.mrb[0].mxu0 }
 0x1f1   : > { %v245_v22 = vmul.f32 %v387_v21, %v387_v21  ;;  %v228_v23 = vpop.f32.mrb[1].mxu0 }
 0x1f2   : > { %v388_v24 = vpop.f32.mrb[2].mxu0  ;;  %v243_v30 = vmul.f32 %v228_v23, %v228_v23 }
 0x1f3   : > { %v231_v25 = vpop.f32.mrb[3].mxu0  ;;  %v254_v26 = vsel %vm247_vm7, %v245_v22, 0.0  ;;  %v246_v28 = vmul.f32 %v388_v24, %v388_v24 }
 0x1f4   : > { %v244_v27 = vmul.f32 %v231_v25, %v231_v25  ;;  %255 = vadd.xlane.f32.xlu1 %v254_v26  ;;  %v248_v32 = vsel %vm247_vm7, %v243_v30, 0.0 }
 0x1f5   : > { %v257_v31 = vsel %vm247_vm7, %v246_v28, 0.0 }
 0x1f6   : > { %v251_v29 = vsel %vm247_vm7, %v244_v27, 0.0 }
 0x1f7   : > { %252 = vadd.xlane.f32.xlu0 %v251_v29 }
 0x1fb   : > { %258 = vadd.xlane.f32.xlu0 %v257_v31 }
 0x1ff   : > { %249 = vadd.xlane.f32.xlu0 %v248_v32 }
 0x281   : > { %v256_v33 = vpop.xlane.xlu1 %255 }
 0x282   : > { %v262_v34 = vadd.f32 1e-12, %v256_v33 }
 0x284   : > { %439 = vrsqrt.f32 %v262_v34  ;;  %v253_v35 = vpop.xlane.xlu0 %252 }
 0x285   : > { %v261_v36 = vadd.f32 1e-12, %v253_v35 }
 0x287   : > { %441 = vrsqrt.f32 %v261_v36 }
 0x288   : > { %v259_v37 = vpop.xlane.xlu0 %258 }
 0x289   : > { %v263_v38 = vadd.f32 1e-12, %v259_v37 }
 0x28b   : > { %443 = vrsqrt.f32 %v263_v38 }
 0x28c   : > { %v250_v45 = vpop.xlane.xlu0 %249 }
 0x28d   : > { %v260_v46 = vadd.f32 1e-12, %v250_v45 }
 0x28e   : > { %v440_v39 = vpop.eup %439 }
 0x28f   : > { %v270_v40 = vmul.f32 %v440_v39, %v387_v21  ;;  %445 = vrsqrt.f32 %v260_v46 }
 0x291   : > { %v442_v41 = vpop.eup %441  ;;  %277 = vrot.lane.b32.xlu0 %v270_v40, %s516_s3 }
 0x292   : > { %v269_v42 = vmul.f32 %v442_v41, %v231_v25 }
 0x294   : > { %273 = vrot.lane.b32.xlu1 %v269_v42, %s517_s4 }
 0x295   : > { %v444_v43 = vpop.eup %443 }
 0x296   : > { %v271_v44 = vmul.f32 %v444_v43, %v388_v24 }
 0x298   : > { %281 = vrot.lane.b32.xlu1 %v271_v44, %s518_s5 }
 0x299   : > { %v446_v47 = vpop.eup %445 }
 0x29a   : > { %v268_v48 = vmul.f32 %v446_v47, %v228_v23 }
 0x303   : > { %v278_v51 = vpop.permute.xlu0 %277 }
 0x306   : > { %v274_v49 = vpop.permute.xlu1 %273 }
 0x307   : > { %v284_v50 = vsel %vm247_vm7, %v268_v48, %v274_v49 }
 0x308   : > { %v286_v53 = vsel %vm285_vm8, %v284_v50, %v278_v51 }
 0x30a   : > { %v282_v52 = vpop.permute.xlu1 %281 }
 0x30b   : > { %v288_v54 = vsel %vm287_vm9, %v286_v53, %v282_v52 }
 0x30c   : > { %289 = vst [vmem:[%s134_s14] sm:$0xff] %v288_v54 }
 0x30d   : > { %460 = shalt.err (!%p457_p3)
}
 0x30e   : > { %s461_s27 = scalar_lea.hbm %s601_s22, 128  ;;  %s465_s30 = scalar_lea.hbm %s645_s2, 256 }
 0x30f   : > { %p462_p4 = scmp.ne.s32.totalorder %s601_s22, %s461_s27  ;;  %p466_p9 = scmp.lt.u32.totalorder %s601_s22, %s645_s2 }
 0x310   : > { %p467_p10 = scmp.lt.u32.totalorder %s465_s30, %s461_s27  ;;  %p469_p12 = scmp.lt.u32.totalorder %s461_s27, %s601_s22 }
 0x311   : > { %p463_p7 = pnand %p462_p4, %p573_p5 }
 0x312   : > { %p468_p11 = por %p467_p10, %p466_p9 }
 0x313   : > { %p464_p8 = pneg %p463_p7 }
 0x314   : > { %p470_p13 = por %p469_p12, %p468_p11 }
 0x316   : > { %p471_p0 = pnand %p470_p13, %p464_p8 }
 0x318   : > { %474 = shalt.err (!%p471_p0)
}
 0x319   : > { %389 = dma.vmem_to_hbm [thread:$0]  (%p573_p5), %s603_s16, 128, %s601_s22, %s291_s23  }
 0x31a PF: > { %p395_p1 = scmp.ge.s32.totalorder %s509_s12, 2  ;;  %s316_s5 = sand.u32 1, %s497_s9  }
 0x31b   : > { %s317_s6 = scalar_lea.sflag [#allocation3], %s316_s5 }
 0x31c   : > { %p392_p2 = pnand %p395_p1, %p577_p6 }
 0x31e   : > { %492 = dma.done.wait (!%p392_p2), %s317_s6, 128  }
 0x31f   : > { %494 = vsyncadd (!%p392_p2), %s317_s6, 4294967168  ;;  %p12_p3 = scmp.ge.s32.totalorder %s560_s15, 4   ;;  %s648_s9 = smov %s501_s10 }
 0x320   : > { %s649_s10 = smov %s505_s11  ;;  %s650_s11 = smov %s571_s18 }
 0x321   : > { %s651_s12 = smov %s560_s15  ;;  %14 = sbr.rel (!%p12_p3) target bundleno = 3 (0x3), region = 63 }
 0x328   :  { %322 = vsyncpa [#allocation3], 1 }
 0x329   :  { %324 = vsyncpa [#allocation3 + $0x1], 1 }

</bundles_post_ra>
